<compile_context>
chip_gen: v6e
topology: v6e:2x2x1
jax: 0.10.0
libtpu: 0.0.40
codegen_flags: <defaults>
</compile_context>

<pallas_src>
import jax
import jax.numpy as jnp
from jax.experimental import pallas as pl
from jax.experimental.pallas import tpu as pltpu

HIDDEN = 256   # fixed by the module
LANE = 128     # TPU lane width
SUBLANE_BF16 = 16


def _round_up(x, m):
    return ((x + m - 1) // m) * m


def _head_kernel(x_ref, w1_ref, b1_ref, w2_ref, b2_ref, o_ref):
    # x_ref:  (TILE_B, D_in)   bf16   (streamed per batch tile)
    # w1_ref: (D_in, 256)      bf16   (VMEM-resident across grid)
    # b1_ref: (1, 256)         f32
    # w2_ref: (256, C_pad)     bf16   (VMEM-resident across grid)
    # b2_ref: (1, C_pad)       f32
    # o_ref:  (TILE_B, C_pad)  f32    (lane-dense store)

    # First linear on the MXU, f32 accumulation.
    h = jnp.dot(x_ref[...], w1_ref[...], preferred_element_type=jnp.float32)
    # Bias + ReLU in f32 on the VPU.
    h = jnp.maximum(h + b1_ref[...], 0.0)
    # Dropout(p=0.1) in eval mode == identity.
    # Second linear: cast activations to bf16 for the MXU, accumulate in f32.
    out = jnp.dot(h.astype(w2_ref.dtype), w2_ref[...],
                  preferred_element_type=jnp.float32)
    o_ref[...] = (out + b2_ref[...]).astype(o_ref.dtype)


def classification_head(x, w1, b1, w2, b2, *, tile_b=256):
    """Fused ClassificationHead forward.

    x:  (B, D_in)       activations (any float dtype)
    w1: (256, D_in)     first Linear weight, PyTorch (out, in) layout
    b1: (256,)          first Linear bias
    w2: (C, 256)        second Linear weight, PyTorch (out, in) layout
    b2: (C,)            second Linear bias
    returns (B, C) float32 logits.
    """
    B, d_in = x.shape
    C = w2.shape[0]
    c_pad = _round_up(C, LANE)

    # ---- host-side weight prep (done once per weight set) -------------------
    w1_t = w1.T.astype(jnp.bfloat16)                                   # (D_in, 256)
    w2_t = jnp.zeros((HIDDEN, c_pad), jnp.bfloat16).at[:, :C].set(
        w2.T.astype(jnp.bfloat16))                                     # (256, C_pad)
    b1_r = b1.reshape(1, HIDDEN).astype(jnp.float32)                   # (1, 256)
    b2_r = jnp.zeros((1, c_pad), jnp.float32).at[:, :C].set(
        b2.astype(jnp.float32))                                        # (1, C_pad)

    # ---- batch tiling --------------------------------------------------------
    # tile_b multiple of 16 (bf16 sublane packing); shrink for tiny batches.
    tile_b = min(tile_b, _round_up(B, SUBLANE_BF16))
    tile_b = max(SUBLANE_BF16, (tile_b // SUBLANE_BF16) * SUBLANE_BF16)

    # Keep double-buffered tiles + resident weights inside a conservative VMEM budget
    # (default scoped limit is 16 MiB on v5e, 32 MiB on v6e/v7x).
    vmem_budget = 12 * 1024 * 1024

    def _vmem_bytes(tb):
        x_bytes = 2 * tb * d_in * 2            # double-buffered bf16 x tile
        o_bytes = 2 * tb * c_pad * 4           # double-buffered f32 out tile
        w_bytes = (d_in * HIDDEN * 2 + HIDDEN * c_pad * 2
                   + HIDDEN * 4 + c_pad * 4)
        return x_bytes + o_bytes + 2 * w_bytes  # conservative (weights may 2x-buffer)

    while tile_b > SUBLANE_BF16 and _vmem_bytes(tile_b) > vmem_budget:
        tile_b = max(SUBLANE_BF16, ((tile_b // 2) // SUBLANE_BF16) * SUBLANE_BF16)

    b_pad = _round_up(B, tile_b)
    x_bf = x.astype(jnp.bfloat16)
    if b_pad != B:
        x_bf = jnp.pad(x_bf, ((0, b_pad - B), (0, 0)))

    grid = (b_pad // tile_b,)

    out = pl.pallas_call(
        _head_kernel,
        out_shape=jax.ShapeDtypeStruct((b_pad, c_pad), jnp.float32),
        grid_spec=pltpu.PrefetchScalarGridSpec(
            num_scalar_prefetch=0,
            grid=grid,
            in_specs=[
                # x: streamed per batch tile (double-buffered by the pipeline)
                pl.BlockSpec((tile_b, d_in), lambda i: (i, 0)),
                # weights / biases: constant index_map -> DMA'd once, VMEM-resident
                pl.BlockSpec((d_in, HIDDEN), lambda i: (0, 0)),
                pl.BlockSpec((1, HIDDEN), lambda i: (0, 0)),
                pl.BlockSpec((HIDDEN, c_pad), lambda i: (0, 0)),
                pl.BlockSpec((1, c_pad), lambda i: (0, 0)),
            ],
            out_specs=pl.BlockSpec((tile_b, c_pad), lambda i: (i, 0)),
        ),
        compiler_params=pltpu.CompilerParams(
            dimension_semantics=("parallel",),
        ),
    )(x_bf, w1_t, b1_r, w2_t, b2_r)

    return out[:B, :C]


if __name__ == "__main__":
    # Small, deterministic example shapes consistent with the module.
    B = 2            # batch
    D_IN = 32        # input_size
    C = 10           # num_classes

    key = jax.random.PRNGKey(0)
    kx, kw1, kb1, kw2, kb2 = jax.random.split(key, 5)

    x = jax.random.normal(kx, (B, D_IN), dtype=jnp.float32)

    # PyTorch nn.Linear stores weight as (out, in).
    w1 = jax.random.normal(kw1, (HIDDEN, D_IN), dtype=jnp.float32) * 0.05
    b1 = jax.random.normal(kb1, (HIDDEN,), dtype=jnp.float32) * 0.05
    w2 = jax.random.normal(kw2, (C, HIDDEN), dtype=jnp.float32) * 0.05
    b2 = jax.random.normal(kb2, (C,), dtype=jnp.float32) * 0.05

    out = classification_head(x, w1, b1, w2, b2)
    out = jax.block_until_ready(out)

    # Pure-JAX f32 reference (eval-mode dropout = identity). The kernel runs
    # the matmuls in bf16 with f32 accumulation, so use bf16-level tolerance.
    h_ref = jnp.maximum(x @ w1.T + b1, 0.0)
    ref = h_ref @ w2.T + b2
    assert out.shape == (B, C)
    assert jnp.allclose(out, ref, atol=2e-2, rtol=2e-2), (
        f"max abs err {jnp.max(jnp.abs(out - ref))}")

    print("KERNEL_OK")
</pallas_src>

<mosaic_0001>
module attributes {stable_mosaic.version = 11 : i64} {
  func.func @_head_kernel(%arg0: i32, %arg1: memref<16x32xbf16, #tpu.memory_space<vmem>>, %arg2: memref<32x256xbf16, #tpu.memory_space<vmem>>, %arg3: memref<1x256xf32, #tpu.memory_space<vmem>>, %arg4: memref<256x128xbf16, #tpu.memory_space<vmem>>, %arg5: memref<1x128xf32, #tpu.memory_space<vmem>>, %arg6: memref<16x128xf32, #tpu.memory_space<vmem>>) attributes {dimension_semantics = [#tpu.dimension_semantics<parallel>], iteration_bounds = array<i64: 1>, scalar_prefetch = 0 : i64, scratch_operands = 0 : i64, tpu.core_type = #tpu.core_type<tc>, window_params = [{transform_indices = @transform_0, window_bounds = array<i64: 16, 32>}, {pipeline_mode = #tpu.pipeline_mode<synchronous>, transform_indices = @transform_1, window_bounds = array<i64: 32, 256>}, {pipeline_mode = #tpu.pipeline_mode<synchronous>, transform_indices = @transform_2, window_bounds = array<i64: 1, 256>}, {pipeline_mode = #tpu.pipeline_mode<synchronous>, transform_indices = @transform_3, window_bounds = array<i64: 256, 128>}, {pipeline_mode = #tpu.pipeline_mode<synchronous>, transform_indices = @transform_4, window_bounds = array<i64: 1, 128>}, {transform_indices = @transform_5, window_bounds = array<i64: 16, 128>}]} {
    %c0 = arith.constant 0 : index
    %c0_0 = arith.constant 0 : index
    %0 = vector.load %arg1[%c0, %c0_0] : memref<16x32xbf16, #tpu.memory_space<vmem>>, vector<16x32xbf16>
    %c0_1 = arith.constant 0 : index
    %c0_2 = arith.constant 0 : index
    %1 = vector.load %arg2[%c0_1, %c0_2] : memref<32x256xbf16, #tpu.memory_space<vmem>>, vector<32x256xbf16>
    %cst = arith.constant dense<0.000000e+00> : vector<16x256xf32>
    %2 = tpu.matmul %0, %1, %cst {dimension_numbers = #tpu.dot_dimension_numbers<[1], [0], [0], [1], [0, 0, 1, 1], [], []>} : vector<16x32xbf16>, vector<32x256xbf16>, vector<16x256xf32> -> vector<16x256xf32>
    %c0_3 = arith.constant 0 : index
    %c0_4 = arith.constant 0 : index
    %3 = vector.load %arg3[%c0_3, %c0_4] : memref<1x256xf32, #tpu.memory_space<vmem>>, vector<1x256xf32>
    %4 = vector.broadcast %3 : vector<1x256xf32> to vector<16x256xf32>
    %5 = arith.addf %2, %4 : vector<16x256xf32>
    %cst_5 = arith.constant 0.000000e+00 : f32
    %6 = vector.broadcast %cst_5 : f32 to vector<16x256xf32>
    %7 = arith.maximumf %5, %6 : vector<16x256xf32>
    %8 = arith.truncf %7 : vector<16x256xf32> to vector<16x256xbf16>
    %c0_6 = arith.constant 0 : index
    %c0_7 = arith.constant 0 : index
    %9 = vector.load %arg4[%c0_6, %c0_7] : memref<256x128xbf16, #tpu.memory_space<vmem>>, vector<256x128xbf16>
    %cst_8 = arith.constant dense<0.000000e+00> : vector<16x128xf32>
    %10 = tpu.matmul %8, %9, %cst_8 {dimension_numbers = #tpu.dot_dimension_numbers<[1], [0], [0], [1], [0, 0, 1, 1], [], []>} : vector<16x256xbf16>, vector<256x128xbf16>, vector<16x128xf32> -> vector<16x128xf32>
    %c0_9 = arith.constant 0 : index
    %c0_10 = arith.constant 0 : index
    %11 = vector.load %arg5[%c0_9, %c0_10] : memref<1x128xf32, #tpu.memory_space<vmem>>, vector<1x128xf32>
    %12 = vector.broadcast %11 : vector<1x128xf32> to vector<16x128xf32>
    %13 = arith.addf %10, %12 : vector<16x128xf32>
    %c0_11 = arith.constant 0 : index
    %c0_12 = arith.constant 0 : index
    %14 = vector.load %arg6[%c0_11, %c0_12] : memref<16x128xf32, #tpu.memory_space<vmem>>, vector<16x128xf32>
    tpu.vector_store %arg6[%c0_11, %c0_12], %13 {strides = array<i32>} : memref<16x128xf32, #tpu.memory_space<vmem>>, vector<16x128xf32>,
    return
  }
  func.func @transform_0(%arg0: i32) -> (i32, i32) {
    %c0_i32 = arith.constant 0 : i32
    %c0_i32_0 = arith.constant 0 : i32
    return %arg0, %c0_i32 : i32, i32
  }
  func.func @transform_1(%arg0: i32) -> (i32, i32) {
    %c0_i32 = arith.constant 0 : i32
    %c0_i32_0 = arith.constant 0 : i32
    %c0_i32_1 = arith.constant 0 : i32
    return %c0_i32, %c0_i32_0 : i32, i32
  }
  func.func @transform_2(%arg0: i32) -> (i32, i32) {
    %c0_i32 = arith.constant 0 : i32
    %c0_i32_0 = arith.constant 0 : i32
    %c0_i32_1 = arith.constant 0 : i32
    return %c0_i32, %c0_i32_0 : i32, i32
  }
  func.func @transform_3(%arg0: i32) -> (i32, i32) {
    %c0_i32 = arith.constant 0 : i32
    %c0_i32_0 = arith.constant 0 : i32
    %c0_i32_1 = arith.constant 0 : i32
    return %c0_i32, %c0_i32_0 : i32, i32
  }
  func.func @transform_4(%arg0: i32) -> (i32, i32) {
    %c0_i32 = arith.constant 0 : i32
    %c0_i32_0 = arith.constant 0 : i32
    %c0_i32_1 = arith.constant 0 : i32
    return %c0_i32, %c0_i32_0 : i32, i32
  }
  func.func @transform_5(%arg0: i32) -> (i32, i32) {
    %c0_i32 = arith.constant 0 : i32
    %c0_i32_0 = arith.constant 0 : i32
    return %arg0, %c0_i32 : i32, i32
  }
}

</mosaic_0001>

<bundles_post_ra>
// kernel: tpu_custom_call.1
= control target key start
LH: loop header
LB: loop body
LE: loop exit
PB: predicated region body
PF: predicated region fallthrough
CT: control target
= control target key end

     0   :  { %10 = vsyncpa [#allocation3], 0  ;;  %s581_s0 = inlined_call_operand.hbm [shape: bf16[16,32], index: 0, kind: input, shape index: {}]   ;;  %s582_s1 = inlined_call_operand.hbm [shape: bf16[32,256], index: 1, kind: input, shape index: {}]   ;;  %s583_s2 = inlined_call_operand.vmem [shape: f32[1,256], index: 2, kind: input, shape index: {}]   ;;  %s584_s3 = inlined_call_operand.hbm [shape: bf16[256,128], index: 3, kind: input, shape index: {}]   ;;  %s585_s4 = inlined_call_operand.vmem [shape: f32[1,128], index: 4, kind: input, shape index: {}]   ;;  %s586_s5 = inlined_call_operand.hbm [shape: f32[16,128], index: 5, kind: output, shape index: {}]  }
   0x1   :  { %11 = vsyncpa [#allocation6], 0 }
   0x2   :  { %12 = vsyncpa [#allocation4], 0  ;;  %s518_s18 = smov [#allocation5]  }
   0x3   :  { %s30_s19 = sshll.u32 %s518_s18, 4  ;;  %s31_s19 = int_to_ptr.vmem [resolvable:$true] %s30_s19 }
   0x4   :  { %s440_s20 = scalar_lea.vmem %s31_s19, 512  ;;  %p445_p1 = scmp.lt.s32.totalorder %s31_s19, %s31_s19 }
   0x5   :  { %p441_p0 = scmp.ne.s32.totalorder %s31_s19, %s440_s20  ;;  %p446_p2 = scmp.lt.s32.totalorder %s440_s20, %s440_s20 }
   0x7   :  { %p447_p3 = por %p446_p2, %p445_p1 }
   0x9   :  { %p448_p4 = pnand %p447_p3, %p441_p0 }
   0xb   :  { %451 = shalt.err (!%p448_p4)
}
   0xc   :  { %s519_s21 = smov 128   ;;  %s520_s22 = smov 8  }
   0xd   :  { %36 = dma.hbm_to_vmem [thread:$0]  %s582_s1, 512, %s31_s19, [#allocation6], %s519_s21, %s519_s21, %s520_s22  }
   0xe   :  { %s521_s25 = smov [#allocation2]  }
   0xf   :  { %s18_s26 = sshll.u32 %s521_s25, 4  ;;  %s19_s26 = int_to_ptr.vmem [resolvable:$true] %s18_s26 }
  0x10   :  { %s460_s27 = scalar_lea.vmem %s19_s26, 128  ;;  %p465_p6 = scmp.lt.s32.totalorder %s19_s26, %s19_s26 }
  0x11   :  { %p461_p5 = scmp.ne.s32.totalorder %s19_s26, %s460_s27  ;;  %p466_p7 = scmp.lt.s32.totalorder %s460_s27, %s460_s27 }
  0x13   :  { %p467_p8 = por %p466_p7, %p465_p6 }
  0x15   :  { %p468_p9 = pnand %p467_p8, %p461_p5 }
  0x17   :  { %471 = shalt.err (!%p468_p9)
}
  0x18   :  { %s522_s28 = smov 64   ;;  %s523_s29 = smov 4  }
  0x19   :  { %24 = dma.hbm_to_vmem [thread:$0]  %s581_s0, 128, %s19_s26, [#allocation3], %s522_s28, %s522_s28, %s523_s29  }
  0x1a   :  { %s524_s7 = smov [#allocation7]  }
  0x1b   :  { %s44_s8 = sshll.u32 %s524_s7, 4  ;;  %s45_s8 = int_to_ptr.vmem [resolvable:$true] %s44_s8 }
  0x1c   :  { %s480_s1 = scalar_lea.vmem %s45_s8, 2048  ;;  %p485_p11 = scmp.lt.s32.totalorder %s45_s8, %s45_s8 }
  0x1d   :  { %p481_p10 = scmp.ne.s32.totalorder %s45_s8, %s480_s1  ;;  %p486_p12 = scmp.lt.s32.totalorder %s480_s1, %s480_s1 }
  0x1f   :  { %p487_p13 = por %p486_p12, %p485_p11 }
  0x21   :  { %p488_p0 = pnand %p487_p13, %p481_p10 }
  0x23   :  { %491 = shalt.err (!%p488_p0)
}
  0x24   :  { %50 = dma.hbm_to_vmem [thread:$0]  %s584_s3, 2048, %s45_s8, [#allocation6], %s522_s28, %s522_s28, %s523_s29  }
  0x25   :  { %512 = dma.done.wait [#allocation3], 128  }
  0x26   :  { %513 = vsyncadd [#allocation3], 4294967168 }
  0x27   :  { %514 = dma.done.wait [#allocation6], 2560  }
  0x28   :  { %515 = vsyncadd [#allocation6], 4294964736  ;;  %v525_v0 = vmov 0   ;;  %v409_v1 = vld [vmem:[#allocation5 + $0x14] ss:$8 sps:$4 sm:$0xff]   ;;  %vm106_vm0 = vcmask 261120   ;;  %v71_v22 = vlaneseq }
  0x29   :  { %142 = vmatprep.mubr.bf16.mxu0 %v525_v0  ;;  %v411_v2 = vld [vmem:[#allocation5 + $0x10] ss:$8 sps:$4 sm:$0xff]   ;;  %122 = vmatprep.subr.bf16.mxu0 %v409_v1  ;;  %v412_v3 = vld [vmem:[#allocation5 + $0x4] ss:$8 sps:$4 sm:$0xff]   ;;  %v414_v4 = vld [vmem:[#allocation5] ss:$8 sps:$4 sm:$0xff]  }
  0x2a   :  { %123 = vmatpush1.bf16.msra.mxu0 %v411_v2  ;;  %v415_v5 = vld [vmem:[#allocation2] sm:$0xff]   ;;  %v418_v8 = vld [vmem:[#allocation7 + $0x70] sm:$0xff]   ;;  %v420_v10 = vld [vmem:[#allocation7 + $0x68] sm:$0xff]   ;;  %v72_v23 = vshrl.u32 %v71_v22, 7  ;;  %s526_s12 = smov [#allocation8]  }
  0x2b   :  { %124 = vmatprep.subr.bf16.mxu0 %v412_v3  ;;  %v416_v6 = vld [vmem:[#allocation7 + $0x78] sm:$0xff]   ;;  %v419_v9 = vld [vmem:[#allocation7 + $0x30] sm:$0xff]   ;;  %v421_v11 = vld [vmem:[#allocation7 + $0x28] sm:$0xff]   ;;  %s342_s13 = sshll.u32 %s526_s12, 4  ;;  %s343_s13 = int_to_ptr.vmem [resolvable:$true] %s342_s13 }
  0x2c   :  { %v417_v7 = vld [vmem:[#allocation7 + $0x38] sm:$0xff]   ;;  %378 = vmatprep.subr.bf16.mxu1 %v416_v6  ;;  %v422_v12 = vld [vmem:[#allocation7 + $0x60] sm:$0xff]   ;;  %v426_v16 = vld [vmem:[#allocation7 + $0x50] sm:$0xff]   ;;  %v77_v24 = vsub.s32 1, %v72_v23  ;;  %v73_v25 = vsub.s32 0, %v72_v23  ;;  %s492_s14 = scalar_lea.vmem %s343_s13, 256  ;;  %p497_p2 = scmp.lt.s32.totalorder %s343_s13, %s343_s13 }
  0x2d   :  { %379 = vmatpush3.bf16.msra.mxu1 %v417_v7  ;;  %v423_v13 = vld [vmem:[#allocation7 + $0x20] sm:$0xff]   ;;  %v424_v14 = vld [vmem:[#allocation7 + $0x58] sm:$0xff]   ;;  %v427_v17 = vld [vmem:[#allocation7 + $0x10] sm:$0xff]   ;;  %p493_p1 = scmp.ne.s32.totalorder %s343_s13, %s492_s14  ;;  %p498_p3 = scmp.lt.s32.totalorder %s492_s14, %s492_s14 }
  0x2e   :  { %125 = vmatpush1.bf16.msra.mxu0 %v414_v4  ;;  %380 = vmatprep.subr.bf16.mxu1 %v418_v8  ;;  %v425_v15 = vld [vmem:[#allocation7 + $0x18] sm:$0xff]   ;;  %v428_v18 = vld [vmem:[#allocation7 + $0x48] sm:$0xff]   ;;  %v430_v20 = vld [vmem:[#allocation7 + $0x40] sm:$0xff]  }
  0x2f   :  { %v429_v19 = vld [vmem:[#allocation7 + $0x8] sm:$0xff]   ;;  %v431_v21 = vld [vmem:[#allocation7] sm:$0xff]   ;;  %v69_v26 = vld [vmem:[%s583_s2] sm:$0x3]  ;;  %p499_p4 = por %p498_p3, %p497_p2 }
  0x30   :  { %v78_v28 = vrot.slane %v69_v26, %v77_v24  ;;  %v74_v29 = vrot.slane %v69_v26, %v73_v25  ;;  %v361_v44 = vld [vmem:[%s585_s4] ss:$0 sm:$0xff] }
  0x31   :  { %360 = vmatmul.mubr.msk.bf16.vlgmr.msra.gmra.mxu0 %vm106_vm0, %v415_v5  ;;  %381 = vmatpush3.bf16.msra.mxu1 %v419_v9  ;;  %p500_p5 = pnand %p499_p4, %p493_p1 }
  0x32   :  { %382 = vmatprep.subr.bf16.mxu1 %v420_v10 }
  0x35   :  { %383 = vmatpush3.bf16.msra.mxu1 %v421_v11 }
  0x36   :  { %384 = vmatprep.subr.bf16.mxu1 %v422_v12 }
  0x39   :  { %385 = vmatpush3.bf16.msra.mxu1 %v423_v13 }
  0x3a   :  { %386 = vmatprep.subr.bf16.mxu1 %v424_v14 }
  0x3d   :  { %387 = vmatpush3.bf16.msra.mxu1 %v425_v15 }
  0x3e   :  { %388 = vmatprep.subr.bf16.mxu1 %v426_v16 }
  0x41   :  { %389 = vmatpush3.bf16.msra.mxu1 %v427_v17 }
  0x42   :  { %390 = vmatprep.subr.bf16.mxu1 %v428_v18 }
  0x45   :  { %391 = vmatpush3.bf16.msra.mxu1 %v429_v19 }
  0x46   :  { %392 = vmatprep.subr.bf16.mxu1 %v430_v20 }
  0x49   :  { %393 = vmatpush3.bf16.msra.mxu1 %v431_v21 }
  0xf1   :  { %v144_v27 = vpop.f32.mrf.mxu0 }
  0xf2   :  { %v145_v34 = vadd.f32 %v144_v27, %v74_v29 }
  0xf3   :  { %v146_v30 = vpop.f32.mrf.mxu0 }
  0xf4   :  { %v147_v32 = vadd.f32 %v146_v30, %v78_v28  ;;  %v153_v40 = vmax.f32 %v145_v34, 0.0 }
  0xf5   :  { %v148_v31 = vpop.f32.mrf.mxu0 }
  0xf6   :  { %v149_v33 = vadd.f32 %v148_v31, %v74_v29  ;;  %v154_v38 = vmax.f32 %v147_v32, 0.0 }
  0xf7   :  { %v150_v35 = vpop.f32.mrf.mxu0 }
  0xf8   :  { %v151_v36 = vadd.f32 %v150_v35, %v78_v28  ;;  %v155_v37 = vmax.f32 %v149_v33, 0.0 }
  0xfa   :  { %v156_v39 = vmax.f32 %v151_v36, 0.0  ;;  %v157_v42 = vpack.c.bf16 %v155_v37, %v153_v40 }
  0xfc   :  { %v158_v41 = vpack.c.bf16 %v156_v39, %v154_v38 }
  0xfe   :  { %326 = vmatprep.mubr.bf16.mxu1 %v158_v41 }
  0xff   :  { %327 = vmatmul.mubr.bf16.vlgmr.msra.gmra.mxu1 %v157_v42 }
 0x1bf   :  { %v394_v43 = vpop.f32.mrf.mxu1 }
 0x1c1   :  { %v395_v45 = vpop.f32.mrf.mxu1 }
 0x1c2   :  { %v396_v46 = vadd.f32 %v395_v45, %v394_v43 }
 0x1c3   :  { %v397_v47 = vpop.f32.mrf.mxu1 }
 0x1c4   :  { %v329_v48 = vadd.f32 %v396_v46, %v361_v44 }
 0x1c5   :  { %v398_v49 = vpop.f32.mrf.mxu1 }
 0x1c6   :  { %335 = vst [vmem:[#allocation8] sm:$0xff] %v329_v48  ;;  %v399_v50 = vadd.f32 %v398_v49, %v397_v47 }
 0x1c8   :  { %v332_v51 = vadd.f32 %v399_v50, %v361_v44 }
 0x1ca   :  { %336 = vst [vmem:[#allocation8 + $0x8] sm:$0xff] %v332_v51 }
 0x1cb   :  { %503 = shalt.err (!%p500_p5)
}
 0x1cc   :  { %348 = dma.vmem_to_hbm [thread:$0]  %s343_s13, 256, %s586_s5, [#allocation4], %s519_s21, %s519_s21, %s520_s22  }
 0x1cd   :  { %516 = dma.done.wait [#allocation4], 256  }
 0x1ce   :  { %517 = vsyncadd [#allocation4], 4294967040 }
 0x1cf   :  { %352 = vsyncpa [#allocation3], 1 }
 0x1d0   :  { %353 = vsyncpa [#allocation6], 1 }
 0x1d1   :  { %354 = vsyncpa [#allocation4], 1 }

</bundles_post_ra>
